<compile_context>
chip_gen: v5e
topology: v5e:2x2
jax: 0.10.0
libtpu: 0.0.40
codegen_flags: <defaults>
</compile_context>

<pallas_src>
import functools

import jax
import jax.numpy as jnp
from jax.experimental import pallas as pl
from jax.experimental.pallas import tpu as pltpu


_FAST_PATH_OUT_BYTES = 256 * 1024      # below this, XLA's fused convert wins
_VMEM_LIMIT_BYTES = 32 * 1024 * 1024   # scoped VMEM limit: safe on v5e/v6e/v7x
_BUF_BUDGET_BYTES = 16 * 1024 * 1024   # double-buffered (in+out) buffer budget
_MIN_TILE_ROWS = 256                   # amortize ~0.35us/step fixed cost
_TARGET_STEPS = 8                      # keep grid long enough for 2-TC split + pipelining
_DEFAULT_COLS = 512                    # fallback lane width (pad path)
_MAX_COLS = 2048


def _convert_kernel(x_ref, o_ref, *, scale: float):
    # Elementwise hot path on the VPU: cast + scale. Always compute in f32
    # (exact for u8/u16; v5e has no native bf16 VALU), cast at the store.
    x = x_ref[...].astype(jnp.float32)
    if scale != 1.0:
        x = x * jnp.asarray(scale, jnp.float32)
    o_ref[...] = x.astype(o_ref.dtype)


def _pick_cols(total: int):
    """Largest multiple of 128 (<= _MAX_COLS) dividing `total`, else None."""
    for c in range(_MAX_COLS, 127, -128):
        if total % c == 0:
            return c
    return None


def convert_image_dtype(image: jax.Array, dtype=jnp.float32, *, use_pallas=None) -> jax.Array:
    """Pallas implementation of torchvision F.convert_image_dtype for
    integer->float (scale by 1/max) and float->float (pure cast)."""
    in_dtype = jnp.dtype(image.dtype)
    out_dtype = jnp.dtype(dtype)

    if not jnp.issubdtype(out_dtype, jnp.floating):
        # TODO(synk): float->int / int->int conversion paths not implemented.
        raise NotImplementedError(
            "ConvertImageDtype Pallas kernel only supports floating target dtypes."
        )

    if in_dtype == out_dtype:
        return image  # matches torch: no-op when dtypes already agree

    if jnp.issubdtype(in_dtype, jnp.integer):
        scale = 1.0 / float(jnp.iinfo(in_dtype).max)
    else:
        scale = 1.0  # float->float (and bool->float) is a pure cast

    orig_shape = image.shape
    total = int(image.size)
    out_bytes = total * out_dtype.itemsize

    if use_pallas is None:
        use_pallas = out_bytes >= _FAST_PATH_OUT_BYTES

    if total == 0 or not use_pallas:
        out = image.astype(out_dtype)
        if scale != 1.0:
            out = out * jnp.asarray(scale, out_dtype)
        return out

    # ---- Flatten to a lane-dense 2D slab (rows, cols). ----
    # Prefer a lane width that divides the element count so the host-side pad
    # and (much more expensive) post-kernel f32 output slice are avoided.
    flat = image.reshape(total)
    cols = _pick_cols(total)
    if cols is None:
        cols = _DEFAULT_COLS
        padded = pl.cdiv(total, cols) * cols
        flat = jnp.pad(flat, (0, padded - total))  # pads the narrow input only
    else:
        padded = total
    rows = padded // cols
    flat2d = flat.reshape(rows, cols)

    # ---- Adaptive row tiling: each block is one contiguous, full-width HBM
    #      stripe; only the row axis is tiled. ----
    bytes_per_row = cols * (in_dtype.itemsize + out_dtype.itemsize) * 2  # 2x buffered
    max_tile_rows = max(32, (_BUF_BUDGET_BYTES // bytes_per_row) // 32 * 32)

    if rows <= _MIN_TILE_ROWS:
        tile_rows = rows  # full-array block: always a legal block shape
    else:
        tile_rows = min(rows, max_tile_rows,
                        max(_MIN_TILE_ROWS, rows // _TARGET_STEPS))
        tile_rows = max(32, (tile_rows // 32) * 32)  # dense packed-u8 sublanes
    grid = (pl.cdiv(rows, tile_rows),)

    kernel = functools.partial(_convert_kernel, scale=scale)

    out2d = pl.pallas_call(
        kernel,
        out_shape=jax.ShapeDtypeStruct((rows, cols), out_dtype),
        grid_spec=pltpu.PrefetchScalarGridSpec(
            num_scalar_prefetch=0,
            grid=grid,
            in_specs=[pl.BlockSpec((tile_rows, cols), lambda i: (i, 0))],
            out_specs=pl.BlockSpec((tile_rows, cols), lambda i: (i, 0)),
        ),
        compiler_params=pltpu.CompilerParams(
            dimension_semantics=("parallel",),  # shard grid across v7x's 2 TCs
            vmem_limit_bytes=_VMEM_LIMIT_BYTES,
        ),
    )(flat2d)

    out_flat = out2d.reshape(padded)
    if padded != total:
        out_flat = out_flat[:total]  # only on the no-divisor fallback path
    return out_flat.reshape(orig_shape)


class ConvertImageDtype:
    """Mirror of the PyTorch module: forward(image, target) -> (image, target)."""

    def __init__(self, dtype=jnp.float32):
        self.dtype = dtype

    def __call__(self, image, target=None):
        return convert_image_dtype(image, self.dtype), target


if __name__ == "__main__":
    key = jax.random.PRNGKey(0)
    k1, k2, k3, k4 = jax.random.split(key, 4)
    module = ConvertImageDtype(jnp.float32)

    def to_u8(k, shape):
        return jax.random.randint(k, shape, minval=0, maxval=256,
                                  dtype=jnp.int32).astype(jnp.uint8)

    # 1) Small NCHW uint8 image (batch=2, channels=4, 16x16), forced through the
    #    Pallas kernel so the kernel path itself is exercised at the spec shape.
    img_small = to_u8(k1, (2, 4, 16, 16))
    out_small = jax.block_until_ready(
        convert_image_dtype(img_small, jnp.float32, use_pallas=True))
    assert out_small.shape == img_small.shape and out_small.dtype == jnp.float32
    assert jnp.allclose(out_small, img_small.astype(jnp.float32) / 255.0, atol=1e-6)

    # 2) Ragged element count (no multiple-of-128 divisor) exercises the
    #    pad + post-slice fallback path.
    img_ragged = to_u8(k2, (2, 3, 17, 19))
    out_ragged = jax.block_until_ready(
        convert_image_dtype(img_ragged, jnp.float32, use_pallas=True))
    assert jnp.allclose(out_ragged, img_ragged.astype(jnp.float32) / 255.0, atol=1e-6)

    # 3) Realistic image via the module API / auto path (divisible lane width,
    #    no pad, no output slice).
    img_big = to_u8(k3, (2, 3, 224, 224))
    out_big, tgt = module(img_big, target=None)
    out_big = jax.block_until_ready(out_big)
    assert out_big.shape == img_big.shape and out_big.dtype == jnp.float32
    assert jnp.allclose(out_big, img_big.astype(jnp.float32) / 255.0, atol=1e-6)
    assert tgt is None

    # 4) Larger image: multi-step tiled grid (several blocks + ragged last
    #    block) exercising the double-buffered pipeline and edge masking.
    img_huge = to_u8(k4, (4, 3, 512, 512))
    out_huge = jax.block_until_ready(
        convert_image_dtype(img_huge, jnp.float32, use_pallas=True))
    assert jnp.allclose(out_huge, img_huge.astype(jnp.float32) / 255.0, atol=1e-6)

    # 5) float -> float pure cast path (bf16 target).
    img_f32 = jax.random.uniform(k1, (2, 4, 32, 32), dtype=jnp.float32)
    out_bf16 = jax.block_until_ready(
        convert_image_dtype(img_f32, jnp.bfloat16, use_pallas=True))
    assert out_bf16.dtype == jnp.bfloat16
    assert jnp.allclose(out_bf16.astype(jnp.float32),
                        img_f32.astype(jnp.bfloat16).astype(jnp.float32))

    print("KERNEL_OK")
</pallas_src>

<mosaic_0001>
module attributes {stable_mosaic.version = 11 : i64} {
  func.func @_convert_kernel(%arg0: i32, %arg1: memref<1x2048xi8, #tpu.memory_space<vmem>>, %arg2: memref<1x2048xf32, #tpu.memory_space<vmem>>) attributes {dimension_semantics = [#tpu.dimension_semantics<parallel>], iteration_bounds = array<i64: 1>, scalar_prefetch = 0 : i64, scratch_operands = 0 : i64, tpu.core_type = #tpu.core_type<tc>, window_params = [{transform_indices = @transform_0, window_bounds = array<i64: 1, 2048>}, {transform_indices = @transform_1, window_bounds = array<i64: 1, 2048>}]} {
    %c0 = arith.constant 0 : index
    %c0_0 = arith.constant 0 : index
    %0 = vector.load %arg1[%c0, %c0_0] : memref<1x2048xi8, #tpu.memory_space<vmem>>, vector<1x2048xi8>
    %1 = arith.uitofp %0 : vector<1x2048xi8> to vector<1x2048xf32>
    %cst = arith.constant 0.00392156886 : f32
    %2 = vector.broadcast %cst : f32 to vector<1x2048xf32>
    %3 = arith.mulf %1, %2 : vector<1x2048xf32>
    %c0_1 = arith.constant 0 : index
    %c0_2 = arith.constant 0 : index
    %4 = vector.load %arg2[%c0_1, %c0_2] : memref<1x2048xf32, #tpu.memory_space<vmem>>, vector<1x2048xf32>
    tpu.vector_store %arg2[%c0_1, %c0_2], %3 {strides = array<i32>} : memref<1x2048xf32, #tpu.memory_space<vmem>>, vector<1x2048xf32>,
    return
  }
  func.func @transform_0(%arg0: i32) -> (i32, i32) {
    %c0_i32 = arith.constant 0 : i32
    %c0_i32_0 = arith.constant 0 : i32
    return %arg0, %c0_i32 : i32, i32
  }
  func.func @transform_1(%arg0: i32) -> (i32, i32) {
    %c0_i32 = arith.constant 0 : i32
    %c0_i32_0 = arith.constant 0 : i32
    return %arg0, %c0_i32 : i32, i32
  }
}

</mosaic_0001>

<bundles_post_ra>
// kernel: tpu_custom_call.1
= control target key start
LH: loop header
LB: loop body
LE: loop exit
PB: predicated region body
PF: predicated region fallthrough
CT: control target
= control target key end

     0   :  { %6 = vsyncpa [#allocation3], 0  ;;  %s207_s0 = inlined_call_operand.hbm [shape: u8[1,2048], index: 0, kind: input, shape index: {}]   ;;  %s208_s1 = inlined_call_operand.hbm [shape: f32[1,2048], index: 1, kind: output, shape index: {}]  }
   0x1   :  { %7 = vsyncpa [#allocation4], 0  ;;  %s13_s8 = sshll.u32 %s207_s0, 4  ;;  %s175_s9 = smov [#allocation2]   ;;  %s14_s8 = int_to_ptr.hbm [resolvable:$true] %s13_s8 }
   0x2   :  { %s15_s10 = sshll.u32 %s175_s9, 4  ;;  %s16_s10 = int_to_ptr.vmem [resolvable:$true] %s15_s10 }
   0x3   :  { %18 = dma.hbm_to_vmem [thread:$0]  %s14_s8, 256, %s16_s10, [#allocation3]  }
   0x4   :  { %171 = dma.done.wait [#allocation3], 256  }
   0x5   :  { %172 = vsyncadd [#allocation3], 4294967040  ;;  %v23_v0 = vld [vmem:[#allocation2] sm:$0xff]  ;;  %vm79_vm0 = vcmask 1040384   ;;  %vm81_vm1 = vcmask 1042434   ;;  %v24_v1 = vld [vmem:[#allocation2 + $0x8] sm:$0xff] }
   0x6   :  { %v25_v2 = vunpack.c.0.s8 %v23_v0  ;;  %v26_v3 = vunpack.c.1.s8 %v23_v0  ;;  %v27_v4 = vunpack.c.2.s8 %v23_v0  ;;  %v28_v5 = vunpack.c.3.s8 %v23_v0  ;;  %s176_s0 = smov [#allocation5]   ;;  %s111_s14 = sshll.u32 %s208_s1, 4  ;;  %s112_s14 = int_to_ptr.hbm [resolvable:$true] %s111_s14 }
   0x7   :  { %vm83_vm2 = vcmask 1041408   ;;  %vm85_vm3 = vcmask 1044484   ;;  %vm87_vm4 = vcmask 1046534   ;;  %vm89_vm5 = vcmask 1045508   ;;  %s109_s11 = sshll.u32 %s176_s0, 4  ;;  %s110_s11 = int_to_ptr.vmem [resolvable:$true] %s109_s11 }
   0x8   :  { %v29_v6 = vunpack.c.0.s8 %v24_v1  ;;  %v30_v7 = vunpack.c.1.s8 %v24_v1  ;;  %v31_v8 = vunpack.c.2.s8 %v24_v1  ;;  %v32_v9 = vunpack.c.3.s8 %v24_v1 }
   0x9   :  { %v33_v10 = vand.u32 255, %v25_v2  ;;  %v34_v11 = vand.u32 255, %v26_v3  ;;  %v35_v12 = vand.u32 255, %v27_v4  ;;  %v36_v13 = vand.u32 255, %v28_v5 }
   0xa   :  { %v37_v14 = vand.u32 255, %v29_v6  ;;  %v38_v15 = vand.u32 255, %v30_v7  ;;  %v39_v16 = vand.u32 255, %v31_v8  ;;  %v40_v17 = vand.u32 255, %v32_v9 }
   0xb   :  { %v41_v18 = vcvt.s32.f32 %v33_v10  ;;  %v42_v19 = vcvt.s32.f32 %v34_v11  ;;  %v43_v20 = vcvt.s32.f32 %v35_v12  ;;  %v44_v21 = vcvt.s32.f32 %v36_v13 }
   0xc   :  { %vm91_vm6 = vcmask 1043456   ;;  %v45_v22 = vcvt.s32.f32 %v37_v14  ;;  %v46_v23 = vcvt.s32.f32 %v38_v15  ;;  %v47_v24 = vcvt.s32.f32 %v39_v16 }
   0xd   :  { %v49_v25 = vmul.f32 0.003921569, %v41_v18  ;;  %v50_v26 = vmul.f32 0.003921569, %v42_v19  ;;  %v51_v27 = vmul.f32 0.003921569, %v43_v20  ;;  %v48_v28 = vcvt.s32.f32 %v40_v17 }
   0xe   :  { %v52_v29 = vmul.f32 0.003921569, %v44_v21  ;;  %v53_v30 = vmul.f32 0.003921569, %v45_v22  ;;  %v54_v31 = vmul.f32 0.003921569, %v46_v23 }
   0xf   :  { %v65_v32 = vrot.slane %v49_v25, 3  ;;  %v66_v33 = vrot.slane %v50_v26, 6  ;;  %v67_v34 = vrot.slane %v50_v26, 1  ;;  %v68_v35 = vrot.slane %v51_v27, 4 }
  0x10   :  { %v69_v36 = vrot.slane %v51_v27, 7  ;;  %v70_v37 = vrot.slane %v52_v29, 2  ;;  %v71_v38 = vrot.slane %v52_v29, 5  ;;  %v55_v39 = vmul.f32 0.003921569, %v47_v24 }
  0x11   :  { %v80_v40 = vsel %vm79_vm0, %v49_v25, %v65_v32  ;;  %v82_v41 = vsel %vm81_vm1, %v66_v33, %v67_v34  ;;  %v56_v42 = vmul.f32 0.003921569, %v48_v28  ;;  %v72_v43 = vrot.slane %v53_v30, 3 }
  0x12   :  { %v84_v44 = vsel %vm83_vm2, %v80_v40, %v82_v41  ;;  %v86_v45 = vsel %vm85_vm3, %v68_v35, %v69_v36  ;;  %v88_v46 = vsel %vm87_vm4, %v70_v37, %v71_v38  ;;  %v73_v47 = vrot.slane %v54_v31, 6 }
  0x13   :  { %v90_v48 = vsel %vm89_vm5, %v86_v45, %v88_v46  ;;  %v74_v49 = vrot.slane %v54_v31, 1  ;;  %v75_v50 = vrot.slane %v55_v39, 4  ;;  %v76_v51 = vrot.slane %v55_v39, 7 }
  0x14   :  { %v92_v52 = vsel %vm91_vm6, %v84_v44, %v90_v48  ;;  %v77_v53 = vrot.slane %v56_v42, 2  ;;  %v78_v54 = vrot.slane %v56_v42, 5  ;;  %v93_v55 = vsel %vm79_vm0, %v53_v30, %v72_v43 }
  0x15   :  { %102 = vst [vmem:[#allocation5] sm:$0xff] %v92_v52  ;;  %v94_v56 = vsel %vm81_vm1, %v73_v47, %v74_v49  ;;  %v96_v57 = vsel %vm85_vm3, %v75_v50, %v76_v51 }
  0x16   :  { %v95_v58 = vsel %vm83_vm2, %v93_v55, %v94_v56  ;;  %v97_v59 = vsel %vm87_vm4, %v77_v53, %v78_v54 }
  0x17   :  { %v98_v60 = vsel %vm89_vm5, %v96_v57, %v97_v59 }
  0x18   :  { %v99_v61 = vsel %vm91_vm6, %v95_v58, %v98_v60 }
  0x19   :  { %103 = vst [vmem:[#allocation5 + $0x8] sm:$0xff] %v99_v61 }
  0x1a   :  { %114 = dma.vmem_to_hbm [thread:$0]  %s110_s11, 256, %s112_s14, [#allocation4]  }
  0x1b   :  { %173 = dma.done.wait [#allocation4], 256  }
  0x1c   :  { %174 = vsyncadd [#allocation4], 4294967040 }
  0x1d   :  { %119 = vsyncpa [#allocation3], 1 }
  0x1e   :  { %120 = vsyncpa [#allocation4], 1 }

</bundles_post_ra>
